<compile_context>
chip_gen: v7x
topology: tpu7x:2x2x1
jax: 0.10.0
libtpu: 0.0.40
codegen_flags: <defaults>
</compile_context>

<pallas_src>
import jax
import jax.numpy as jnp
from jax.experimental import pallas as pl
from jax.experimental.pallas import tpu as pltpu


def _round_up(n, m):
    return ((n + m - 1) // m) * m


def _pad_axis(arr, axis, target, value=0.0):
    pad = target - arr.shape[axis]
    if pad <= 0:
        return arr
    cfg = [(0, 0)] * arr.ndim
    cfg[axis] = (0, pad)
    return jnp.pad(arr, cfg, constant_values=value)


def _choose_batch_tile(B, per_batch_bytes, vmem_budget_bytes=8 << 20):
    """Pick the per-step batch tile TB and the padded batch size B_pad.

    Streamed tiles are double-buffered by the BlockSpec pipeline, so live VMEM is
    roughly 2 * TB * per_batch_bytes (+ resident weights).  The 8 MiB budget stays
    well under the scoped-VMEM defaults of every generation (16 MiB v5e,
    32 MiB v6e/v7x) even before vmem_limit_bytes is raised.
    """
    tb = max(1, vmem_budget_bytes // max(1, 2 * per_batch_bytes))
    tb = min(B, tb)
    # Keep >= 2 grid steps when the batch is big enough so both v7x TensorCores
    # get work from dimension_semantics=("parallel",).
    if tb >= B and B >= 16:
        tb = B // 2
    if tb >= B:
        return B, B                      # single step; block dim == full batch dim
    tb = max(8, (tb // 8) * 8)           # (8,128) rule: a tiled 2nd-minor dim must be %8
    return tb, _round_up(B, tb)


def _paa_body(x_ref, v_ref, qp_ref, mb_ref, wu_ref, wt_ref, o_ref,
              f_ref=None, ww_ref=None):
    TB, S, D_in = x_ref.shape
    A = wu_ref.shape[-1]

    # Projections at M = TB*S rows; native-dtype operands, f32 accumulation.
    x2 = x_ref[...].reshape(TB * S, D_in)
    proj = jnp.dot(x2, wu_ref[...], preferred_element_type=jnp.float32)
    if f_ref is not None:
        f2 = f_ref[...].reshape(TB * S, f_ref.shape[-1])
        proj = proj + jnp.dot(f2, ww_ref[...], preferred_element_type=jnp.float32)
    # q-projection with every bias pre-folded (computed once in the wrapper).
    proj = proj.reshape(TB, S, A) + qp_ref[...][:, None, :]

    h = jnp.tanh(proj)                                           # EUP
    scores = jnp.sum(h * wt_ref[...], axis=-1, keepdims=True)    # [TB,S,1] lane reduce
    scores = scores + mb_ref[...]                                # additive 0/-inf mask

    # Per-batch softmax over the sequence (sublane) axis.
    smax = jnp.max(scores, axis=1, keepdims=True)                # [TB,1,1]
    e = jnp.exp(scores - smax)
    denom = jnp.sum(e, axis=1, keepdims=True)
    w = e * pl.reciprocal(denom, approx=True)                    # EUP reciprocal

    out = jnp.sum(w * v_ref[...], axis=1)                        # [TB, D_v]
    o_ref[...] = out.astype(o_ref.dtype)


def _kernel_with_f(x_ref, v_ref, qp_ref, mb_ref, f_ref, wu_ref, ww_ref, wt_ref, o_ref):
    _paa_body(x_ref, v_ref, qp_ref, mb_ref, wu_ref, wt_ref, o_ref,
              f_ref=f_ref, ww_ref=ww_ref)


def _kernel_no_f(x_ref, v_ref, qp_ref, mb_ref, wu_ref, wt_ref, o_ref):
    _paa_body(x_ref, v_ref, qp_ref, mb_ref, wu_ref, wt_ref, o_ref)


def position_aware_attention(x, x_mask, q, wu, bu, wv, bv, wt, bt=None,
                             f=None, ww=None, bw=None, values=None):
    """Forward pass of PositionAwareAttention.

    x: [B,S,input_size]   x_mask: [B,S] bool (True = masked)   q: [B,query_size]
    f: [B,S,feature_size] or None (feature_size == 0 / wlinear is None).
    Weights stored [in, out] (transpose of nn.Linear.weight); biases 1-D.
    values: tensor bmm'd with the attention weights; defaults to x
            (pass lstm_units for the lstm_layer=True branch).
    bt is accepted for interface parity but has no effect on the output
    (a uniform additive scalar cancels under softmax), so it is dropped.
    Returns [B, values.shape[-1]] in values.dtype.
    """
    del bt  # softmax-invariant
    f32 = jnp.float32
    B, S, D_in = x.shape
    A = wu.shape[-1]
    if values is None:
        values = x
    D_v = values.shape[-1]
    out_dtype = values.dtype
    has_f = (f is not None) and (ww is not None)

    S_pad = _round_up(S, 8)
    A_pad = _round_up(A, 128)

    # Pre-fold the q projection + all biases into one [B, A] array (tiny XLA GEMM).
    bias = bu.astype(f32) + bv.astype(f32)
    if has_f:
        bias = bias + bw.astype(f32)
    qp = jnp.dot(q, wv, preferred_element_type=f32) + bias            # [B, A]
    qp = _pad_axis(qp.astype(f32), 1, A_pad)                          # [B, A_pad]

    wu_p = _pad_axis(wu, 1, A_pad)                                    # [D_in, A_pad]
    wt_p = _pad_axis(jnp.asarray(wt, f32).reshape(1, -1), 1, A_pad)   # [1, A_pad]

    # Additive mask bias: 0 keeps, -inf masks; padded sequence slots are masked.
    mbias = jnp.where(x_mask, -jnp.inf, 0.0).astype(f32)              # [B, S]
    if S_pad > S:
        mbias = jnp.pad(mbias, ((0, 0), (0, S_pad - S)),
                        constant_values=-jnp.inf)

    # Batch tile size from a conservative VMEM budget (double-buffered tiles).
    per_batch = (S_pad * (D_in + (f.shape[-1] if has_f else 0)) * x.dtype.itemsize
                 + S_pad * D_v * values.dtype.itemsize
                 + S_pad * 4 + A_pad * 4
                 + D_v * jnp.dtype(out_dtype).itemsize)
    TB, B_pad = _choose_batch_tile(B, per_batch)

    x_p = _pad_axis(_pad_axis(x, 1, S_pad), 0, B_pad)
    v_p = _pad_axis(_pad_axis(values, 1, S_pad), 0, B_pad)
    qp_p = _pad_axis(qp, 0, B_pad)
    mb_p = _pad_axis(mbias, 0, B_pad)[..., None]                      # [B_pad,S_pad,1]

    in_specs = [
        pl.BlockSpec((TB, S_pad, D_in), lambda b: (b, 0, 0)),         # x
        pl.BlockSpec((TB, S_pad, D_v), lambda b: (b, 0, 0)),          # values
        pl.BlockSpec((TB, A_pad), lambda b: (b, 0)),                  # q_proj (+biases)
        pl.BlockSpec((TB, S_pad, 1), lambda b: (b, 0, 0)),            # mask bias
    ]
    operands = [x_p, v_p, qp_p, mb_p]

    if has_f:
        D_f = f.shape[-1]
        f_p = _pad_axis(_pad_axis(f, 1, S_pad), 0, B_pad)
        ww_p = _pad_axis(ww, 1, A_pad)
        in_specs += [
            pl.BlockSpec((TB, S_pad, D_f), lambda b: (b, 0, 0)),      # f
            pl.BlockSpec((D_in, A_pad), lambda b: (0, 0)),            # U  (resident)
            pl.BlockSpec((D_f, A_pad), lambda b: (0, 0)),             # W  (resident)
            pl.BlockSpec((1, A_pad), lambda b: (0, 0)),               # t  (resident)
        ]
        operands += [f_p, wu_p, ww_p, wt_p]
        kernel = _kernel_with_f
    else:
        in_specs += [
            pl.BlockSpec((D_in, A_pad), lambda b: (0, 0)),            # U  (resident)
            pl.BlockSpec((1, A_pad), lambda b: (0, 0)),               # t  (resident)
        ]
        operands += [wu_p, wt_p]
        kernel = _kernel_no_f

    out = pl.pallas_call(
        kernel,
        out_shape=jax.ShapeDtypeStruct((B_pad, D_v), out_dtype),
        grid_spec=pltpu.PrefetchScalarGridSpec(
            num_scalar_prefetch=0,
            grid=(B_pad // TB,),
            in_specs=in_specs,
            out_specs=pl.BlockSpec((TB, D_v), lambda b: (b, 0)),
        ),
        compiler_params=pltpu.CompilerParams(
            dimension_semantics=("parallel",),
            vmem_limit_bytes=32 * 1024 * 1024,
        ),
    )(*operands)
    return out[:B]


if __name__ == "__main__":
    # Small shapes consistent with the module's forward (exercise S/A padding).
    B, S = 3, 10
    input_size, query_size, feature_size, attn_size = 32, 32, 16, 32

    key = jax.random.PRNGKey(0)
    ks = jax.random.split(key, 12)
    x = jax.random.normal(ks[0], (B, S, input_size), dtype=jnp.float32)
    q = jax.random.normal(ks[1], (B, query_size), dtype=jnp.float32)
    f = jax.random.normal(ks[2], (B, S, feature_size), dtype=jnp.float32)
    lstm_units = jax.random.normal(ks[3], (B, S, 24), dtype=jnp.float32)

    # Parameters stored [in, out] (transpose of nn.Linear.weight).  The PyTorch
    # init zeroes tlinear.weight, which would make the check degenerate; use
    # small random values instead.
    wu = 0.1 * jax.random.normal(ks[4], (input_size, attn_size), dtype=jnp.float32)
    bu = 0.1 * jax.random.normal(ks[5], (attn_size,), dtype=jnp.float32)
    wv = 0.1 * jax.random.normal(ks[6], (query_size, attn_size), dtype=jnp.float32)
    bv = 0.1 * jax.random.normal(ks[7], (attn_size,), dtype=jnp.float32)
    ww = 0.1 * jax.random.normal(ks[8], (feature_size, attn_size), dtype=jnp.float32)
    bw = 0.1 * jax.random.normal(ks[9], (attn_size,), dtype=jnp.float32)
    wt = 0.1 * jax.random.normal(ks[10], (attn_size,), dtype=jnp.float32)
    bt = jnp.float32(0.05)

    # x_mask: True = padded position (masked with -inf), as in masked_fill_.
    lengths = jnp.array([8, 5, 10], dtype=jnp.int32)
    x_mask = jnp.arange(S)[None, :] >= lengths[:, None]               # [B, S] bool

    # Pure-JAX reference of the exact PyTorch forward math.
    def reference(use_f, vals):
        x_proj = jnp.einsum('bsd,da->bsa', x, wu) + bu
        q_proj = (q @ wv + bv)[:, None, :]
        s = x_proj + q_proj
        if use_f:
            s = s + jnp.einsum('bsd,da->bsa', f, ww) + bw
        h = jnp.tanh(s)
        sc = jnp.einsum('bsa,a->bs', h, wt) + bt
        sc = jnp.where(x_mask, -jnp.inf, sc)
        w = jax.nn.softmax(sc, axis=-1)
        return jnp.einsum('bs,bsd->bd', w, vals)

    # 1) feature_size > 0 branch, values = x.
    out = position_aware_attention(x, x_mask, q, wu, bu, wv, bv, wt, bt,
                                   f=f, ww=ww, bw=bw)
    out = jax.block_until_ready(out)
    ref = reference(True, x)
    assert out.shape == (B, input_size) and out.dtype == x.dtype
    assert float(jnp.max(jnp.abs(out - ref))) < 1e-2

    # 2) feature_size == 0 branch (wlinear is None): kernel variant without f.
    out_nf = jax.block_until_ready(
        position_aware_attention(x, x_mask, q, wu, bu, wv, bv, wt, bt))
    assert float(jnp.max(jnp.abs(out_nf - reference(False, x)))) < 1e-2

    # 3) lstm_layer=True branch: attention weights bmm'd with lstm_units.
    out_lstm = jax.block_until_ready(
        position_aware_attention(x, x_mask, q, wu, bu, wv, bv, wt, bt,
                                 f=f, ww=ww, bw=bw, values=lstm_units))
    assert out_lstm.shape == (B, 24) and out_lstm.dtype == lstm_units.dtype
    assert float(jnp.max(jnp.abs(out_lstm - reference(True, lstm_units)))) < 1e-2

    print("KERNEL_OK")
</pallas_src>

<mosaic_0001>
module attributes {stable_mosaic.version = 11 : i64} {
  func.func @_kernel_with_f(%arg0: i32, %arg1: memref<3x16x32xf32, #tpu.memory_space<vmem>>, %arg2: memref<3x16x32xf32, #tpu.memory_space<vmem>>, %arg3: memref<3x128xf32, #tpu.memory_space<vmem>>, %arg4: memref<3x16x1xf32, #tpu.memory_space<vmem>>, %arg5: memref<3x16x16xf32, #tpu.memory_space<vmem>>, %arg6: memref<32x128xf32, #tpu.memory_space<vmem>>, %arg7: memref<16x128xf32, #tpu.memory_space<vmem>>, %arg8: memref<1x128xf32, #tpu.memory_space<vmem>>, %arg9: memref<3x32xf32, #tpu.memory_space<vmem>>) attributes {dimension_semantics = [#tpu.dimension_semantics<parallel>], iteration_bounds = array<i64: 1>, scalar_prefetch = 0 : i64, scratch_operands = 0 : i64, tpu.core_type = #tpu.core_type<tc>, window_params = [{transform_indices = @transform_0, window_bounds = array<i64: 3, 16, 32>}, {transform_indices = @transform_1, window_bounds = array<i64: 3, 16, 32>}, {transform_indices = @transform_2, window_bounds = array<i64: 3, 128>}, {transform_indices = @transform_3, window_bounds = array<i64: 3, 16, 1>}, {transform_indices = @transform_4, window_bounds = array<i64: 3, 16, 16>}, {pipeline_mode = #tpu.pipeline_mode<synchronous>, transform_indices = @transform_5, window_bounds = array<i64: 32, 128>}, {pipeline_mode = #tpu.pipeline_mode<synchronous>, transform_indices = @transform_6, window_bounds = array<i64: 16, 128>}, {pipeline_mode = #tpu.pipeline_mode<synchronous>, transform_indices = @transform_7, window_bounds = array<i64: 1, 128>}, {transform_indices = @transform_8, window_bounds = array<i64: 3, 32>}]} {
    %c0 = arith.constant 0 : index
    %c0_0 = arith.constant 0 : index
    %c0_1 = arith.constant 0 : index
    %0 = vector.load %arg1[%c0, %c0_0, %c0_1] : memref<3x16x32xf32, #tpu.memory_space<vmem>>, vector<3x16x32xf32>
    %1 = vector.shape_cast %0 : vector<3x16x32xf32> to vector<48x32xf32>
    %c0_2 = arith.constant 0 : index
    %c0_3 = arith.constant 0 : index
    %2 = vector.load %arg6[%c0_2, %c0_3] : memref<32x128xf32, #tpu.memory_space<vmem>>, vector<32x128xf32>
    %cst = arith.constant dense<0.000000e+00> : vector<48x128xf32>
    %3 = tpu.matmul %1, %2, %cst {dimension_numbers = #tpu.dot_dimension_numbers<[1], [0], [0], [1], [0, 0, 1, 1], [], []>} : vector<48x32xf32>, vector<32x128xf32>, vector<48x128xf32> -> vector<48x128xf32>
    %c0_4 = arith.constant 0 : index
    %c0_5 = arith.constant 0 : index
    %c0_6 = arith.constant 0 : index
    %4 = vector.load %arg5[%c0_4, %c0_5, %c0_6] : memref<3x16x16xf32, #tpu.memory_space<vmem>>, vector<3x16x16xf32>
    %5 = vector.shape_cast %4 : vector<3x16x16xf32> to vector<48x16xf32>
    %c0_7 = arith.constant 0 : index
    %c0_8 = arith.constant 0 : index
    %6 = vector.load %arg7[%c0_7, %c0_8] : memref<16x128xf32, #tpu.memory_space<vmem>>, vector<16x128xf32>
    %cst_9 = arith.constant dense<0.000000e+00> : vector<48x128xf32>
    %7 = tpu.matmul %5, %6, %cst_9 {dimension_numbers = #tpu.dot_dimension_numbers<[1], [0], [0], [1], [0, 0, 1, 1], [], []>} : vector<48x16xf32>, vector<16x128xf32>, vector<48x128xf32> -> vector<48x128xf32>
    %8 = arith.addf %3, %7 : vector<48x128xf32>
    %9 = vector.shape_cast %8 : vector<48x128xf32> to vector<3x16x128xf32>
    %c0_10 = arith.constant 0 : index
    %c0_11 = arith.constant 0 : index
    %10 = vector.load %arg3[%c0_10, %c0_11] : memref<3x128xf32, #tpu.memory_space<vmem>>, vector<3x128xf32>
    %11 = vector.shape_cast %10 : vector<3x128xf32> to vector<3x1x128xf32>
    %12 = vector.broadcast %11 : vector<3x1x128xf32> to vector<3x16x128xf32>
    %13 = arith.addf %9, %12 : vector<3x16x128xf32>
    %14 = math.tanh %13 : vector<3x16x128xf32>
    %c0_12 = arith.constant 0 : index
    %c0_13 = arith.constant 0 : index
    %15 = vector.load %arg8[%c0_12, %c0_13] : memref<1x128xf32, #tpu.memory_space<vmem>>, vector<1x128xf32>
    %16 = vector.shape_cast %15 : vector<1x128xf32> to vector<1x1x128xf32>
    %17 = vector.broadcast %16 : vector<1x1x128xf32> to vector<3x16x128xf32>
    %18 = arith.mulf %14, %17 : vector<3x16x128xf32>
    %cst_14 = arith.constant dense<0.000000e+00> : vector<3x16xf32>
    %19 = vector.multi_reduction <add>, %18, %cst_14 [2] : vector<3x16x128xf32> to vector<3x16xf32>
    %20 = vector.shape_cast %19 : vector<3x16xf32> to vector<3x16x1xf32>
    %c0_15 = arith.constant 0 : index
    %c0_16 = arith.constant 0 : index
    %c0_17 = arith.constant 0 : index
    %21 = vector.load %arg4[%c0_15, %c0_16, %c0_17] : memref<3x16x1xf32, #tpu.memory_space<vmem>>, vector<3x16x1xf32>
    %22 = arith.addf %20, %21 : vector<3x16x1xf32>
    %cst_18 = arith.constant dense<0xFF800000> : vector<3x1xf32>
    %23 = vector.multi_reduction <maximumf>, %22, %cst_18 [1] : vector<3x16x1xf32> to vector<3x1xf32>
    %24 = vector.shape_cast %23 : vector<3x1xf32> to vector<3x1x1xf32>
    %25 = vector.broadcast %24 : vector<3x1x1xf32> to vector<3x16x1xf32>
    %26 = arith.subf %22, %25 : vector<3x16x1xf32>
    %27 = math.exp %26 : vector<3x16x1xf32>
    %cst_19 = arith.constant dense<0.000000e+00> : vector<3x1xf32>
    %28 = vector.multi_reduction <add>, %27, %cst_19 [1] : vector<3x16x1xf32> to vector<3x1xf32>
    %29 = vector.shape_cast %28 : vector<3x1xf32> to vector<3x1x1xf32>
    %30 = tpu.reciprocal %29 {approx = true} : vector<3x1x1xf32> -> vector<3x1x1xf32>
    %31 = vector.broadcast %30 : vector<3x1x1xf32> to vector<3x16x1xf32>
    %32 = arith.mulf %27, %31 : vector<3x16x1xf32>
    %c0_20 = arith.constant 0 : index
    %c0_21 = arith.constant 0 : index
    %c0_22 = arith.constant 0 : index
    %33 = vector.load %arg2[%c0_20, %c0_21, %c0_22] : memref<3x16x32xf32, #tpu.memory_space<vmem>>, vector<3x16x32xf32>
    %34 = vector.broadcast %32 : vector<3x16x1xf32> to vector<3x16x32xf32>
    %35 = arith.mulf %34, %33 : vector<3x16x32xf32>
    %cst_23 = arith.constant dense<0.000000e+00> : vector<3x32xf32>
    %36 = vector.multi_reduction <add>, %35, %cst_23 [1] : vector<3x16x32xf32> to vector<3x32xf32>
    %c0_24 = arith.constant 0 : index
    %c0_25 = arith.constant 0 : index
    %37 = vector.load %arg9[%c0_24, %c0_25] : memref<3x32xf32, #tpu.memory_space<vmem>>, vector<3x32xf32>
    tpu.vector_store %arg9[%c0_24, %c0_25], %36 {strides = array<i32>} : memref<3x32xf32, #tpu.memory_space<vmem>>, vector<3x32xf32>,
    return
  }
  func.func @transform_0(%arg0: i32) -> (i32, i32, i32) {
    %c0_i32 = arith.constant 0 : i32
    %c0_i32_0 = arith.constant 0 : i32
    %c0_i32_1 = arith.constant 0 : i32
    return %arg0, %c0_i32, %c0_i32_0 : i32, i32, i32
  }
  func.func @transform_1(%arg0: i32) -> (i32, i32, i32) {
    %c0_i32 = arith.constant 0 : i32
    %c0_i32_0 = arith.constant 0 : i32
    %c0_i32_1 = arith.constant 0 : i32
    return %arg0, %c0_i32, %c0_i32_0 : i32, i32, i32
  }
  func.func @transform_2(%arg0: i32) -> (i32, i32) {
    %c0_i32 = arith.constant 0 : i32
    %c0_i32_0 = arith.constant 0 : i32
    return %arg0, %c0_i32 : i32, i32
  }
  func.func @transform_3(%arg0: i32) -> (i32, i32, i32) {
    %c0_i32 = arith.constant 0 : i32
    %c0_i32_0 = arith.constant 0 : i32
    %c0_i32_1 = arith.constant 0 : i32
    return %arg0, %c0_i32, %c0_i32_0 : i32, i32, i32
  }
  func.func @transform_4(%arg0: i32) -> (i32, i32, i32) {
    %c0_i32 = arith.constant 0 : i32
    %c0_i32_0 = arith.constant 0 : i32
    %c0_i32_1 = arith.constant 0 : i32
    return %arg0, %c0_i32, %c0_i32_0 : i32, i32, i32
  }
  func.func @transform_5(%arg0: i32) -> (i32, i32) {
    %c0_i32 = arith.constant 0 : i32
    %c0_i32_0 = arith.constant 0 : i32
    %c0_i32_1 = arith.constant 0 : i32
    return %c0_i32, %c0_i32_0 : i32, i32
  }
  func.func @transform_6(%arg0: i32) -> (i32, i32) {
    %c0_i32 = arith.constant 0 : i32
    %c0_i32_0 = arith.constant 0 : i32
    %c0_i32_1 = arith.constant 0 : i32
    return %c0_i32, %c0_i32_0 : i32, i32
  }
  func.func @transform_7(%arg0: i32) -> (i32, i32) {
    %c0_i32 = arith.constant 0 : i32
    %c0_i32_0 = arith.constant 0 : i32
    %c0_i32_1 = arith.constant 0 : i32
    return %c0_i32, %c0_i32_0 : i32, i32
  }
  func.func @transform_8(%arg0: i32) -> (i32, i32) {
    %c0_i32 = arith.constant 0 : i32
    %c0_i32_0 = arith.constant 0 : i32
    return %arg0, %c0_i32 : i32, i32
  }
}

</mosaic_0001>

<bundles_post_ra>
// kernel: tpu_custom_call.1
= control target key start
LH: loop header
LB: loop body
LE: loop exit
PB: predicated region body
PF: predicated region fallthrough
CT: control target
= control target key end

     0   :  { %13 = vsyncpa [#allocation3], 0  ;;  %s1047_s0 = inlined_call_operand.vmem [shape: f32[3,16,32], index: 0, kind: input, shape index: {}]   ;;  %s1048_s1 = inlined_call_operand.hbm [shape: f32[3,16,32], index: 1, kind: input, shape index: {}]   ;;  %s1049_s2 = inlined_call_operand.hbm [shape: f32[3,128], index: 2, kind: input, shape index: {}]   ;;  %s1050_s3 = inlined_call_operand.vmem [shape: f32[3,16,1], index: 3, kind: input, shape index: {}]   ;;  %s1051_s4 = inlined_call_operand.hbm [shape: f32[3,16,16], index: 4, kind: input, shape index: {}]   ;;  %s1052_s5 = inlined_call_operand.hbm [shape: f32[32,128], index: 5, kind: input, shape index: {}]   ;;  %s1053_s6 = inlined_call_operand.vmem [shape: f32[16,128], index: 6, kind: input, shape index: {}]   ;;  %s1054_s7 = inlined_call_operand.vmem [shape: f32[1,128], index: 7, kind: input, shape index: {}]   ;;  %s1055_s8 = inlined_call_operand.hbm [shape: f32[3,32], index: 8, kind: output, shape index: {}]  }
   0x1   :  { %14 = vsyncpa [#allocation6], 0 }
   0x2   :  { %15 = vsyncpa [#allocation9], 0 }
   0x3   :  { %16 = vsyncpa [#allocation4], 0  ;;  %s835_s27 = smov [#allocation5]   ;;  %s836_s29 = smov [#allocation2]  }
   0x4   :  { %s37_s28 = sshll.u32 %s835_s27, 4  ;;  %s24_s30 = sshll.u32 %s836_s29, 4  ;;  %s38_s28 = int_to_ptr.vmem [resolvable:$true] %s37_s28  ;;  %s889_s30 = int_to_ptr.vmem [resolvable:$true] %s24_s30 }
   0x5   :  { %s717_s11 = scalar_lea.hbm %s1049_s2, 64 }
   0x6   :  { %p718_p0 = scmp.ne.s32.totalorder %s1049_s2, %s717_s11  ;;  %p721_p1 = scmp.lt.u32.totalorder %s717_s11, %s1049_s2 }
   0x8   :  { %p723_p2 = pnand %p721_p1, %p718_p0 }
   0xa   :  { %726 = shalt.err (!%p723_p2)
}
   0xb   :  { %s727_s16 = scalar_lea.vmem %s38_s28, 64  ;;  %p732_p4 = scmp.lt.s32.totalorder %s38_s28, %s38_s28 }
   0xc   :  { %p728_p3 = scmp.ne.s32.totalorder %s38_s28, %s727_s16  ;;  %p733_p5 = scmp.lt.s32.totalorder %s727_s16, %s727_s16 }
   0xe   :  { %p734_p6 = por %p733_p5, %p732_p4 }
  0x10   :  { %p735_p7 = pnand %p734_p6, %p728_p3 }
  0x12   :  { %738 = shalt.err (!%p735_p7)
}
  0x13   :  { %40 = dma.hbm_to_vmem [thread:$0]  %s1049_s2, 64, %s38_s28, [#allocation6]  }
  0x14   :  { %s739_s21 = scalar_lea.hbm %s1048_s1, 768 }
  0x15   :  { %p740_p8 = scmp.ne.s32.totalorder %s1048_s1, %s739_s21  ;;  %p743_p9 = scmp.lt.u32.totalorder %s739_s21, %s1048_s1 }
  0x17   :  { %p745_p10 = pnand %p743_p9, %p740_p8 }
  0x19   :  { %748 = shalt.err (!%p745_p10)
}
  0x1a   :  { %s749_s26 = scalar_lea.vmem %s889_s30, 768  ;;  %p754_p12 = scmp.lt.s32.totalorder %s889_s30, %s889_s30 }
  0x1b   :  { %p750_p11 = scmp.ne.s32.totalorder %s889_s30, %s749_s26  ;;  %p755_p13 = scmp.lt.s32.totalorder %s749_s26, %s749_s26 }
  0x1d   :  { %p756_p0 = por %p755_p13, %p754_p12 }
  0x1f   :  { %p757_p1 = pnand %p756_p0, %p750_p11 }
  0x21   :  { %760 = shalt.err (!%p757_p1)
}
  0x22   :  { %s837_s2 = smov 128   ;;  %s838_s27 = smov 8  }
  0x23   :  { %30 = dma.hbm_to_vmem [thread:$0]  %s1048_s1, 768, %s889_s30, [#allocation3], %s837_s2, %s837_s2, %s838_s27  }
  0x24   :  { %s839_s9 = smov [#allocation7]   ;;  %s840_s11 = smov [#allocation8]  }
  0x25   :  { %s48_s10 = sshll.u32 %s839_s9, 4  ;;  %s60_s12 = sshll.u32 %s840_s11, 4  ;;  %s49_s10 = int_to_ptr.vmem [resolvable:$true] %s48_s10  ;;  %s923_s12 = int_to_ptr.vmem [resolvable:$true] %s60_s12 }
  0x26   :  { %s761_s15 = scalar_lea.hbm %s1051_s4, 768 }
  0x27   :  { %p762_p2 = scmp.ne.s32.totalorder %s1051_s4, %s761_s15  ;;  %p765_p3 = scmp.lt.u32.totalorder %s761_s15, %s1051_s4 }
  0x29   :  { %p767_p4 = pnand %p765_p3, %p762_p2 }
  0x2b   :  { %770 = shalt.err (!%p767_p4)
}
  0x2c   :  { %s771_s1 = scalar_lea.vmem %s49_s10, 768  ;;  %p776_p6 = scmp.lt.s32.totalorder %s49_s10, %s49_s10 }
  0x2d   :  { %p772_p5 = scmp.ne.s32.totalorder %s49_s10, %s771_s1  ;;  %p777_p7 = scmp.lt.s32.totalorder %s771_s1, %s771_s1 }
  0x2f   :  { %p778_p8 = por %p777_p7, %p776_p6 }
  0x31   :  { %p779_p9 = pnand %p778_p8, %p772_p5 }
  0x33   :  { %782 = shalt.err (!%p779_p9)
}
  0x34   :  { %54 = dma.hbm_to_vmem [thread:$0]  %s1051_s4, 768, %s49_s10, [#allocation6], %s837_s2, %s837_s2, %s838_s27  }
  0x35   :  { %s783_s23 = scalar_lea.hbm %s1052_s5, 512 }
  0x36   :  { %p784_p10 = scmp.ne.s32.totalorder %s1052_s5, %s783_s23  ;;  %p787_p11 = scmp.lt.u32.totalorder %s783_s23, %s1052_s5 }
  0x38   :  { %p789_p12 = pnand %p787_p11, %p784_p10 }
  0x3a   :  { %792 = shalt.err (!%p789_p12)
}
  0x3b   :  { %s793_s29 = scalar_lea.vmem %s923_s12, 512  ;;  %p798_p0 = scmp.lt.s32.totalorder %s923_s12, %s923_s12 }
  0x3c   :  { %p794_p13 = scmp.ne.s32.totalorder %s923_s12, %s793_s29  ;;  %p799_p1 = scmp.lt.s32.totalorder %s793_s29, %s793_s29 }
  0x3e   :  { %p800_p2 = por %p799_p1, %p798_p0 }
  0x40   :  { %p801_p3 = pnand %p800_p2, %p794_p13 }
  0x42   :  { %804 = shalt.err (!%p801_p3)
}
  0x43   :  { %66 = dma.hbm_to_vmem [thread:$0]  %s1052_s5, 512, %s923_s12, [#allocation9], %s837_s2, %s837_s2, %s838_s27  }
  0x44   :  { %827 = dma.done.wait [#allocation3], 768  }
  0x45   :  { %828 = vsyncadd [#allocation3], 4294966528 }
  0x46   :  { %829 = dma.done.wait [#allocation6], 832  }
  0x47   :  { %830 = vsyncadd [#allocation6], 4294966464 }
  0x48   :  { %831 = dma.done.wait [#allocation9], 512  }
  0x49   :  { %832 = vsyncadd [#allocation9], 4294966784  ;;  %v89_v0 = vld [vmem:[#allocation8] sm:$0xff]  ;;  %v90_v1 = vld [vmem:[#allocation8 + $0x8] sm:$0xff]  ;;  %vm101_vm0 = vcmask 130048   ;;  %vm215_vm1 = vcmask 261120   ;;  %v342_v23 = vlaneseq }
  0x4a   :  { %v99_v2 = vld [vmem:[%s1053_s6] sm:$0xff]  ;;  %v662_v3 = vpack.c.bf16 %v90_v1, %v89_v0  ;;  %v100_v4 = vld [vmem:[%s1053_s6 + $0x8] sm:$0xff]  ;;  %v91_v5 = vld [vmem:[#allocation8 + $0x10] sm:$0xff]  ;;  %v841_v21 = vmov 1966171168   ;;  %vm418_vm2 = vcmask 7168  }
  0x4b   :  { %v92_v6 = vld [vmem:[#allocation8 + $0x18] sm:$0xff]  ;;  %v658_v7 = vpack.c.bf16 %v100_v4, %v99_v2  ;;  %v93_v9 = vld [vmem:[#allocation7] sm:$0xff]  ;;  %v95_v12 = vld [vmem:[#allocation7 + $0x10] sm:$0xff]  ;;  %v340_v22 = vunpack.c.l.s4 %v841_v21  ;;  %v343_v25 = vshrl.u32 %v342_v23, 7  ;;  %vm572_vm3 = vcmask 1041409  }
  0x4c   :  { %v666_v8 = vpack.c.bf16 %v92_v6, %v91_v5  ;;  %663 = vmatprep.subr.bf16.mxu0 %v662_v3  ;;  %632 = vmatprep.mubr.msk.f32.mxu1 %vm101_vm0, %v93_v9  ;;  %v83_v10 = vld [vmem:[%s1047_s0] sm:$0xff]  ;;  %v84_v13 = vld [vmem:[%s1047_s0 + $0x8] sm:$0xff]  ;;  %v85_v15 = vld [vmem:[%s1047_s0 + $0x10] sm:$0xff]  ;;  %v842_v9 = vmov 0   ;;  %vm574_vm4 = vcmask 1042434   ;;  %vm577_vm5 = vcmask 256000  }
  0x4d   :  { %665 = vmatpush3.bf16.msra.mxu0 %v662_v3  ;;  %659 = vmatprep.subr.bf16.mxu1 %v658_v7  ;;  %v94_v11 = vld [vmem:[#allocation7 + $0x8] sm:$0xff]  ;;  %v96_v14 = vld [vmem:[#allocation7 + $0x18] sm:$0xff]  ;;  %v97_v16 = vld [vmem:[#allocation7 + $0x20] sm:$0xff]  ;;  %v341_v24 = vunpack.c.0.s8 %v340_v22  ;;  %v356_v29 = vsub.s32 0, %v343_v25 }
  0x4e   :  { %661 = vmatpush3.bf16.msra.mxu1 %v658_v7  ;;  %667 = vmatprep.subr.bf16.mxu0 %v666_v8  ;;  %v86_v17 = vld [vmem:[%s1047_s0 + $0x18] sm:$0xff]  ;;  %v87_v18 = vld [vmem:[%s1047_s0 + $0x20] sm:$0xff]  ;;  %v88_v20 = vld [vmem:[%s1047_s0 + $0x28] sm:$0xff] }
  0x4f   :  { %649 = vmatprep.mubr.msk.f32.mxu0 %vm215_vm1, %v83_v10  ;;  %v98_v19 = vld [vmem:[#allocation7 + $0x28] sm:$0xff]  ;;  %v344_v26 = vsub.s32 %v341_v24, %v343_v25  ;;  %v608_v27 = vld.sshfl [vmem:[#allocation5] sm:$0x13 pattern:$0x75316420]  ;;  %686 = vset.pattern.permute.xlu1 %v842_v9  ;;  %v407_v10 = vld [vmem:[%s1050_s3 + $0x8] sm:$0xff] }
  0x50   :  { %v338_v30 = vcombine.high %v608_v27, %v608_v27  ;;  %v609_v60 = vld [vmem:[%s1054_s7] ss:$0 sm:$0xff]  ;;  %685 = vset.pattern.permute.xlu0 %v842_v9 }
  0x51   :  { %669 = vmatpush3.bf16.msra.mxu0 %v666_v8  ;;  %633 = vmatmul.mubr.msk.f32.vlgmr.msra.gmra.mrb[0].mxu1 %vm101_vm0, %v94_v11  ;;  %v345_v28 = vrot.slane %v608_v27, %v344_v26  ;;  %v410_v22 = vld [vmem:[%s1050_s3 + $0x20] sm:$0xff] }
  0x52   :  { %635 = vmatprep.mubr.msk.f32.mxu1 %vm101_vm0, %v95_v12  ;;  %v352_v34 = vrot.slane %v338_v30, %v344_v26  ;;  %v406_v12 = vld [vmem:[%s1050_s3] sm:$0xff] }
  0x53   :  { %v357_v33 = vrot.slane %v345_v28, %v356_v29  ;;  %v353_v43 = vcombine.high %v345_v28, %v345_v28  ;;  %v411_v28 = vld [vmem:[%s1050_s3 + $0x28] sm:$0xff] }
  0x54   :  { %650 = vmatmul.mubr.msk.f32.vlgmr.msra.gmra.mrb[0].mxu0 %vm215_vm1, %v84_v13  ;;  %v361_v42 = vrot.slane %v352_v34, %v356_v29 }
  0x55   :  { %636 = vmatmul.mubr.msk.f32.gmra.mrb[2].mxu1 %vm101_vm0, %v96_v14  ;;  %652 = vmatprep.mubr.msk.f32.mxu0 %vm215_vm1, %v85_v15  ;;  %v365_v52 = vrot.slane %v353_v43, %v356_v29  ;;  %v409_v14 = vld [vmem:[%s1050_s3 + $0x18] sm:$0xff] }
  0x56   :  { %638 = vmatprep.mubr.msk.f32.mxu1 %vm101_vm0, %v97_v16 }
  0x58   :  { %653 = vmatmul.mubr.msk.f32.gmra.mrb[2].mxu0 %vm215_vm1, %v86_v17 }
  0x59   :  { %655 = vmatprep.mubr.msk.f32.mxu0 %vm215_vm1, %v87_v18  ;;  %639 = vmatmul.mubr.msk.f32.gmra.mrb[4].mxu1 %vm101_vm0, %v98_v19  ;;  %v408_v18 = vld [vmem:[%s1050_s3 + $0x10] sm:$0xff]  ;;  %s843_s3 = smov [#allocation10]  }
  0x5a   :  { %s585_s11 = sshll.u32 %s843_s3, 4  ;;  %s586_s11 = int_to_ptr.vmem [resolvable:$true] %s585_s11 }
  0x5b   :  { %s805_s13 = scalar_lea.vmem %s586_s11, 64  ;;  %p810_p5 = scmp.lt.s32.totalorder %s586_s11, %s586_s11 }
  0x5c   :  { %656 = vmatmul.mubr.msk.f32.gmra.mrb[4].mxu0 %vm215_vm1, %v88_v20  ;;  %p806_p4 = scmp.ne.s32.totalorder %s586_s11, %s805_s13  ;;  %p811_p6 = scmp.lt.s32.totalorder %s805_s13, %s805_s13 }
  0x5e   :  { %p812_p7 = por %p811_p6, %p810_p5 }
  0x60   :  { %p813_p8 = pnand %p812_p7, %p806_p4 }
 0x124   :  { %v634_v31 = vpop.f32.mrb[0].mxu1 }
 0x125   :  { %v186_v32 = vpop.f32.mrb[1].mxu1 }
 0x127   :  { %v651_v35 = vpop.f32.mrb[0].mxu0 }
 0x128   :  { %v306_v36 = vadd.f32 %v651_v35, %v634_v31  ;;  %v300_v37 = vpop.f32.mrb[1].mxu0  ;;  %v637_v38 = vpop.f32.mrb[2].mxu1 }
 0x129   :  { %v301_v39 = vadd.f32 %v300_v37, %v186_v32  ;;  %v196_v40 = vpop.f32.mrb[3].mxu1 }
 0x12a   :  { %v370_v41 = vadd.f32 %v357_v33, %v306_v36 }
 0x12b   :  { %v369_v44 = vadd.f32 %v357_v33, %v301_v39  ;;  %v654_v45 = vpop.f32.mrb[2].mxu0 }
 0x12c   :  { %687 = vtanh.f32 %v370_v41  ;;  %v316_v46 = vadd.f32 %v654_v45, %v637_v38  ;;  %v310_v47 = vpop.f32.mrb[3].mxu0  ;;  %v640_v48 = vpop.f32.mrb[4].mxu1 }
 0x12d   :  { %v311_v49 = vadd.f32 %v310_v47, %v196_v40  ;;  %v206_v50 = vpop.f32.mrb[5].mxu1  ;;  %689 = vtanh.f32 %v369_v44 }
 0x12e   :  { %v372_v51 = vadd.f32 %v361_v42, %v316_v46 }
 0x12f   :  { %v371_v53 = vadd.f32 %v361_v42, %v311_v49  ;;  %v657_v54 = vpop.f32.mrb[4].mxu0 }
 0x130   :  { %691 = vtanh.f32 %v372_v51  ;;  %v326_v55 = vadd.f32 %v657_v54, %v640_v48  ;;  %v320_v56 = vpop.f32.mrb[5].mxu0 }
 0x131   :  { %v321_v57 = vadd.f32 %v320_v56, %v206_v50  ;;  %693 = vtanh.f32 %v371_v53 }
 0x132   :  { %v374_v58 = vadd.f32 %v365_v52, %v326_v55 }
 0x133   :  { %v373_v59 = vadd.f32 %v365_v52, %v321_v57 }
 0x134   :  { %695 = vtanh.f32 %v374_v58 }
 0x135   :  { %697 = vtanh.f32 %v373_v59 }
 0x136   :  { %v688_v61 = vpop.eup %687 }
 0x137   :  { %v389_v62 = vmul.f32 %v688_v61, %v609_v60  ;;  %v690_v63 = vpop.eup %689 }
 0x138   :  { %v388_v2 = vmul.f32 %v690_v63, %v609_v60 }
 0x139   :  { %396 = vadd.xlane.f32.xlu0 %v389_v62 }
 0x13a   :  { %v692_v0 = vpop.eup %691 }
 0x13b   :  { %v391_v1 = vmul.f32 %v692_v0, %v609_v60  ;;  %v694_v3 = vpop.eup %693 }
 0x13c   :  { %v390_v6 = vmul.f32 %v694_v3, %v609_v60 }
 0x13d   :  { %400 = vadd.xlane.f32.xlu1 %v391_v1  ;;  %394 = vadd.xlane.f32.xlu0 %v388_v2 }
 0x13e   :  { %v696_v4 = vpop.eup %695 }
 0x13f   :  { %v698_v5 = vpop.eup %697  ;;  %v393_v8 = vmul.f32 %v696_v4, %v609_v60 }
 0x140   :  { %v392_v7 = vmul.f32 %v698_v5, %v609_v60 }
 0x141   :  { %398 = vadd.xlane.f32.xlu1 %v390_v6 }
 0x142   :  { %402 = vadd.xlane.f32.xlu0 %v392_v7 }
 0x145   :  { %404 = vadd.xlane.f32.xlu1 %v393_v8 }
 0x1c6   :  { %v397_v11 = vpop.xlane.xlu0 %396 }
 0x1c7   :  { %v413_v13 = vadd.f32 %v407_v10, %v397_v11 }
 0x1c9   :  { %v420_v19 = vsel %vm418_vm2, %v413_v13, -inf }
 0x1ca   :  { %v401_v15 = vpop.xlane.xlu1 %400  ;;  %v395_v16 = vpop.xlane.xlu0 %394 }
 0x1cb   :  { %v412_v17 = vadd.f32 %v406_v12, %v395_v16  ;;  %v415_v20 = vadd.f32 %v409_v14, %v401_v15 }
 0x1cd   :  { %v419_v21 = vsel %vm418_vm2, %v412_v17, -inf  ;;  %v429_v30 = vsel %vm418_vm2, %v415_v20, -inf }
 0x1ce   :  { %v421_v23 = vmax.f32 %v419_v21, %v420_v19  ;;  %v399_v24 = vpop.xlane.xlu1 %398 }
 0x1cf   :  { %v414_v25 = vadd.f32 %v408_v18, %v399_v24  ;;  %v403_v26 = vpop.xlane.xlu0 %402 }
 0x1d0   :  { %v422_v27 = vrot.slane %v421_v23, 4  ;;  %v416_v29 = vadd.f32 %v410_v22, %v403_v26 }
 0x1d1   :  { %v428_v31 = vsel %vm418_vm2, %v414_v25, -inf }
 0x1d2   :  { %v423_v32 = vmax.f32 %v421_v23, %v422_v27  ;;  %v430_v33 = vmax.f32 %v428_v31, %v429_v30  ;;  %v405_v34 = vpop.xlane.xlu1 %404  ;;  %v437_v36 = vsel %vm418_vm2, %v416_v29, -inf }
 0x1d3   :  { %v417_v35 = vadd.f32 %v411_v28, %v405_v34 }
 0x1d4   :  { %v424_v37 = vrot.slane %v423_v32, 2  ;;  %v431_v38 = vrot.slane %v430_v33, 4 }
 0x1d5   :  { %v438_v39 = vsel %vm418_vm2, %v417_v35, -inf }
 0x1d6   :  { %v425_v40 = vmax.f32 %v423_v32, %v424_v37  ;;  %v432_v41 = vmax.f32 %v430_v33, %v431_v38  ;;  %v439_v42 = vmax.f32 %v437_v36, %v438_v39 }
 0x1d8   :  { %v426_v43 = vrot.slane %v425_v40, 1  ;;  %v433_v44 = vrot.slane %v432_v41, 2  ;;  %v440_v45 = vrot.slane %v439_v42, 4 }
 0x1da   :  { %v427_v46 = vmax.f32 %v425_v40, %v426_v43  ;;  %v434_v47 = vmax.f32 %v432_v41, %v433_v44  ;;  %v441_v48 = vmax.f32 %v439_v42, %v440_v45  ;;  %v501_v45 = vld [vmem:[#allocation2 + $0x8] sm:$0xff] }
 0x1dc   :  { %v446_v49 = vsub.f32 %v412_v17, %v427_v46  ;;  %v447_v50 = vsub.f32 %v413_v13, %v427_v46  ;;  %v435_v51 = vrot.slane %v434_v47, 1  ;;  %v442_v52 = vrot.slane %v441_v48, 2  ;;  %v500_v46 = vld [vmem:[#allocation2] sm:$0xff] }
 0x1de   :  { %v452_v53 = vmul.f32 1.442695, %v446_v49  ;;  %v454_v54 = vmul.f32 1.442695, %v447_v50  ;;  %v436_v55 = vmax.f32 %v434_v47, %v435_v51  ;;  %v443_v56 = vmax.f32 %v441_v48, %v442_v52 }
 0x1e0   :  { %699 = vpow2.f32 %v452_v53  ;;  %v448_v57 = vsub.f32 %v414_v25, %v436_v55  ;;  %v449_v58 = vsub.f32 %v415_v20, %v436_v55  ;;  %v444_v59 = vrot.slane %v443_v56, 1  ;;  %v502_v53 = vld [vmem:[#allocation2 + $0x10] sm:$0xff]  ;;  %v503_v55 = vld [vmem:[#allocation2 + $0x18] sm:$0xff] }
 0x1e1   :  { %701 = vpow2.f32 %v454_v54 }
 0x1e2   :  { %v456_v60 = vmul.f32 1.442695, %v448_v57  ;;  %v458_v61 = vmul.f32 1.442695, %v449_v58  ;;  %v445_v62 = vmax.f32 %v443_v56, %v444_v59 }
 0x1e4   :  { %703 = vpow2.f32 %v456_v60  ;;  %v450_v63 = vsub.f32 %v416_v29, %v445_v62  ;;  %v451_v0 = vsub.f32 %v417_v35, %v445_v62 }
 0x1e5   :  { %705 = vpow2.f32 %v458_v61 }
 0x1e6   :  { %v460_v1 = vmul.f32 1.442695, %v450_v63  ;;  %v462_v2 = vmul.f32 1.442695, %v451_v0  ;;  %v504_v0 = vld [vmem:[#allocation2 + $0x20] sm:$0xff] }
 0x1e8   :  { %707 = vpow2.f32 %v460_v1 }
 0x1e9   :  { %709 = vpow2.f32 %v462_v2 }
 0x1ea   :  { %v700_v3 = vpop.eup %699 }
 0x1eb   :  { %v702_v4 = vpop.eup %701  ;;  %v464_v5 = vsel %vm418_vm2, %v700_v3, 0.0 }
 0x1ec   :  { %v465_v6 = vsel %vm418_vm2, %v702_v4, 0.0 }
 0x1ed   :  { %v466_v7 = vadd.f32 %v465_v6, %v464_v5 }
 0x1ee   :  { %v704_v8 = vpop.eup %703 }
 0x1ef   :  { %v706_v9 = vpop.eup %705  ;;  %v467_v10 = vrot.slane %v466_v7, 4  ;;  %v473_v11 = vsel %vm418_vm2, %v704_v8, 0.0 }
 0x1f0   :  { %v474_v12 = vsel %vm418_vm2, %v706_v9, 0.0 }
 0x1f1   :  { %v468_v13 = vadd.f32 %v467_v10, %v466_v7  ;;  %v475_v14 = vadd.f32 %v474_v12, %v473_v11 }
 0x1f2   :  { %v708_v15 = vpop.eup %707 }
 0x1f3   :  { %v710_v16 = vpop.eup %709  ;;  %v476_v17 = vrot.slane %v475_v14, 4  ;;  %v482_v18 = vsel %vm418_vm2, %v708_v15, 0.0  ;;  %v469_v19 = vrot.slane %v468_v13, 2 }
 0x1f4   :  { %v483_v20 = vsel %vm418_vm2, %v710_v16, 0.0 }
 0x1f5   :  { %v477_v21 = vadd.f32 %v476_v17, %v475_v14  ;;  %v484_v22 = vadd.f32 %v483_v20, %v482_v18  ;;  %v470_v23 = vadd.f32 %v469_v19, %v468_v13 }
 0x1f7   :  { %v485_v24 = vrot.slane %v484_v22, 4  ;;  %v471_v25 = vrot.slane %v470_v23, 1  ;;  %v478_v26 = vrot.slane %v477_v21, 2 }
 0x1f9   :  { %v486_v27 = vadd.f32 %v485_v24, %v484_v22  ;;  %v472_v28 = vadd.f32 %v471_v25, %v470_v23  ;;  %v479_v29 = vadd.f32 %v478_v26, %v477_v21 }
 0x1fb   :  { %711 = vrcp.f32 %v472_v28  ;;  %v480_v30 = vrot.slane %v479_v29, 1  ;;  %v487_v31 = vrot.slane %v486_v27, 2 }
 0x1fd   :  { %v481_v32 = vadd.f32 %v480_v30, %v479_v29  ;;  %v488_v33 = vadd.f32 %v487_v31, %v486_v27 }
 0x1ff   :  { %713 = vrcp.f32 %v481_v32  ;;  %v489_v34 = vrot.slane %v488_v33, 1 }
 0x201   :  { %v490_v35 = vadd.f32 %v489_v34, %v488_v33 }
 0x203   :  { %715 = vrcp.f32 %v490_v35 }
 0x205   :  { %v712_v36 = vpop.eup %711 }
 0x206   :  { %v495_v37 = vmul.f32 %v712_v36, %v702_v4  ;;  %v494_v38 = vmul.f32 %v712_v36, %v700_v3  ;;  %v505_v3 = vld [vmem:[#allocation2 + $0x28] sm:$0xff] }
 0x208   :  { %513 = vperm.xlu1 %686, %v495_v37   ;;  %508 = vperm.xlu0 %685, %v494_v38  }
 0x209   :  { %v714_v39 = vpop.eup %713 }
 0x20a   :  { %v496_v40 = vmul.f32 %v714_v39, %v704_v8  ;;  %v497_v41 = vmul.f32 %v714_v39, %v706_v9 }
 0x20c   :  { %518 = vperm.xlu1 %686, %v496_v40  }
 0x20d   :  { %v716_v42 = vpop.eup %715 }
 0x20e   :  { %v498_v43 = vmul.f32 %v716_v42, %v708_v15  ;;  %v499_v44 = vmul.f32 %v716_v42, %v710_v16 }
 0x210   :  { %523 = vperm.xlu1 %686, %v497_v41  }
 0x214   :  { %528 = vperm.xlu1 %686, %v498_v43  }
 0x218   :  { %533 = vperm.xlu1 %686, %v499_v44  }
 0x287   :  { %v514_v47 = vpop.permute.xlu1 %513  ;;  %v509_v48 = vpop.permute.xlu0 %508 }
 0x288   :  { %v537_v49 = vmul.f32 %v514_v47, %v501_v45  ;;  %v536_v50 = vmul.f32 %v509_v48, %v500_v46 }
 0x28a   :  { %v543_v51 = vsel %vm215_vm1, %v537_v49, 0.0  ;;  %v542_v52 = vsel %vm215_vm1, %v536_v50, 0.0 }
 0x28b   :  { %v519_v54 = vpop.permute.xlu1 %518  ;;  %v544_v56 = vadd.f32 %v543_v51, %v542_v52 }
 0x28c   :  { %v538_v57 = vmul.f32 %v519_v54, %v502_v53 }
 0x28d   :  { %v545_v60 = vrot.slane %v544_v56, 4 }
 0x28e   :  { %v551_v61 = vsel %vm215_vm1, %v538_v57, 0.0 }
 0x28f   :  { %v524_v58 = vpop.permute.xlu1 %523  ;;  %v546_v4 = vadd.f32 %v545_v60, %v544_v56 }
 0x290   :  { %v539_v59 = vmul.f32 %v524_v58, %v503_v55 }
 0x291   :  { %v547_v10 = vrot.slane %v546_v4, 2 }
 0x292   :  { %v552_v62 = vsel %vm215_vm1, %v539_v59, 0.0 }
 0x293   :  { %v553_v63 = vadd.f32 %v552_v62, %v551_v61  ;;  %v529_v1 = vpop.permute.xlu1 %528  ;;  %v548_v16 = vadd.f32 %v547_v10, %v546_v4 }
 0x294   :  { %v540_v5 = vmul.f32 %v529_v1, %v504_v0 }
 0x295   :  { %v554_v2 = vrot.slane %v553_v63, 4  ;;  %v549_v20 = vrot.slane %v548_v16, 1 }
 0x296   :  { %v560_v11 = vsel %vm215_vm1, %v540_v5, 0.0 }
 0x297   :  { %v555_v6 = vadd.f32 %v554_v2, %v553_v63  ;;  %v534_v7 = vpop.permute.xlu1 %533  ;;  %v550_v24 = vadd.f32 %v549_v20, %v548_v16 }
 0x298   :  { %v541_v8 = vmul.f32 %v534_v7, %v505_v3 }
 0x299   :  { %v556_v9 = vrot.slane %v555_v6, 2 }
 0x29a   :  { %v561_v12 = vsel %vm215_vm1, %v541_v8, 0.0 }
 0x29b   :  { %v562_v13 = vadd.f32 %v561_v12, %v560_v11  ;;  %v557_v14 = vadd.f32 %v556_v9, %v555_v6 }
 0x29d   :  { %v563_v15 = vrot.slane %v562_v13, 4  ;;  %v558_v18 = vrot.slane %v557_v14, 1 }
 0x29f   :  { %v564_v17 = vadd.f32 %v563_v15, %v562_v13  ;;  %v559_v22 = vadd.f32 %v558_v18, %v557_v14 }
 0x2a1   :  { %v565_v19 = vrot.slane %v564_v17, 2  ;;  %v573_v26 = vsel %vm572_vm3, %v559_v22, %v550_v24 }
 0x2a3   :  { %v566_v21 = vadd.f32 %v565_v19, %v564_v17 }
 0x2a5   :  { %v567_v23 = vrot.slane %v566_v21, 1 }
 0x2a7   :  { %v568_v25 = vadd.f32 %v567_v23, %v566_v21 }
 0x2a9   :  { %v575_v27 = vsel %vm574_vm4, %v568_v25, %v573_v26 }
 0x2aa   :  { %578 = vst.msk [vmem:[#allocation10] sm:$0x7] %vm577_vm5, %v575_v27 }
 0x2ab   :  { %816 = shalt.err (!%p813_p8)
}
 0x2ac   :  { %s817_s2 = scalar_lea.hbm %s1055_s8, 64 }
 0x2ad   :  { %p818_p9 = scmp.ne.s32.totalorder %s1055_s8, %s817_s2  ;;  %p821_p10 = scmp.lt.u32.totalorder %s817_s2, %s1055_s8 }
 0x2af   :  { %p823_p11 = pnand %p821_p10, %p818_p9 }
 0x2b1   :  { %826 = shalt.err (!%p823_p11)
}
 0x2b2   :  { %588 = dma.vmem_to_hbm [thread:$0]  %s586_s11, 64, %s1055_s8, [#allocation4]  }
 0x2b3   :  { %833 = dma.done.wait [#allocation4], 64  }
 0x2b4   :  { %834 = vsyncadd [#allocation4], 4294967232 }
 0x2b5   :  { %592 = vsyncpa [#allocation3], 1 }
 0x2b6   :  { %593 = vsyncpa [#allocation6], 1 }
 0x2b7   :  { %594 = vsyncpa [#allocation9], 1 }
 0x2b8   :  { %595 = vsyncpa [#allocation4], 1 }

</bundles_post_ra>
